<compile_context>
chip_gen: v5e
topology: v5e:2x2
jax: 0.10.0
libtpu: 0.0.40
codegen_flags: <defaults>
</compile_context>

<pallas_src>
import jax
import jax.numpy as jnp
import numpy as np
from jax import lax
from jax.experimental import pallas as pl
from jax.experimental.pallas import tpu as pltpu

RELU_SLOPE = 0.2
EPS = 1e-5
P = 2  # image rows packed per slab row (lanes = P*W*C = 128 at the test config)


def _make_kernel(N, Hp, W, C):
    R = N * Hp          # slab rows   (one per packed row pair per image)
    L = P * W * C       # slab lanes  (p, x, c) with c fastest
    Ch = C // 2
    inv_hw = 1.0 / float(P * Hp * W)

    def kernel(x_ref, t1_ref, b1_ref, t2_ref, b2_ref, g_ref, bt_ref,
               rsel_ref, rselT_ref, csum2_ref, o_ref):
        # x_ref / o_ref : (R, L) f32       rows = (n, y//2), lanes = (y%2, x, c)
        # t*_ref        : (3L, L) bf16     stacked block-Toeplitz conv weights
        # b*_ref        : (1, L)  f32      conv biases tiled over (p, x)
        # g_ref/bt_ref  : (1, L)  f32      InstanceNorm affine params tiled over (p, x)
        # rsel_ref      : (N, R)  f32      0/1 "rows of image n" selector
        # rselT_ref     : (R, N)  f32      its transpose (broadcast back per image)
        # csum2_ref     : (2L,2L) f32      blockdiag(same-channel, same-channel) matrix
        x = x_ref[...]                                             # f32 (R, L)

        row_in_img = lax.broadcasted_iota(jnp.int32, (R, 1), 0) % Hp
        keep_dn = row_in_img >= 1          # rows where "previous packed row" is in-image
        keep_up = row_in_img < Hp - 1      # rows where "next packed row" is in-image
        lane_chan = lax.broadcasted_iota(jnp.int32, (1, L), 1) % C
        hin_mask = lane_chan < Ch

        def lrelu(v):
            return jnp.where(v >= 0, v, RELU_SLOPE * v)

        def conv3x3(v, t_ref, b_ref):
            # Packed-row shifts via XLU roll; circular-wrap / cross-image rows are
            # zeroed by the keep masks (== y zero-padding of the SAME conv).
            dn = jnp.where(keep_dn, pltpu.roll(v, 1, axis=0), 0.0)      # v[r-1]
            up = jnp.where(keep_up, pltpu.roll(v, R - 1, axis=0), 0.0)  # v[r+1]
            # One K=3L bf16 MXU push per conv (3x3 y/x taps + x padding folded into t).
            cat = jnp.concatenate([dn, v, up], axis=1).astype(jnp.bfloat16)
            acc = jnp.dot(cat, t_ref[...], preferred_element_type=jnp.float32)
            return acc + b_ref[...]

        # ---- conv_1 + LeakyReLU -------------------------------------------------
        h = lrelu(conv3x3(x, t1_ref, b1_ref))                      # f32 (R, L)

        # ---- HIN: InstanceNorm2d(affine=True) on first C//2 channels ------------
        # Batched one-pass stats: 3 small f32 matmuls total.
        hh = jnp.concatenate([h, h * h], axis=1)                   # (R, 2L)
        s_all = jnp.dot(rsel_ref[...], hh,
                        preferred_element_type=jnp.float32)        # (N, 2L) per-image sums
        red = jnp.dot(s_all, csum2_ref[...],
                      preferred_element_type=jnp.float32) * inv_hw # (N, 2L) per-channel
        mean = red[:, :L]
        ex2 = red[:, L:]
        var = jnp.maximum(ex2 - mean * mean, 0.0)                  # clamp one-pass var
        rstd = lax.rsqrt(var + EPS)
        stats = jnp.concatenate([mean, rstd], axis=1)              # (N, 2L)
        stats_r = jnp.dot(rselT_ref[...], stats,
                          preferred_element_type=jnp.float32)      # (R, 2L) broadcast back
        mean_r = stats_r[:, :L]
        rstd_r = stats_r[:, L:]
        normed = (h - mean_r) * rstd_r * g_ref[...] + bt_ref[...]
        feat = jnp.where(hin_mask, normed, h)

        # ---- conv_2 + LeakyReLU + residual add ----------------------------------
        h2 = lrelu(conv3x3(feat, t2_ref, b2_ref))
        o_ref[...] = (x + h2).astype(o_ref.dtype)

    return kernel


def _build_toeplitz_packed(w_hwio, W):
    """(3,3,Cin,Cout) HWIO conv weight -> (3*P*W*Cin, P*W*Cout) stacked block-Toeplitz.

    Chunk dp (dp = 0,1,2) multiplies the input slab shifted by packed-row offset dp-1.
    For lanes (p_in, x_in, c_in) x (p_out, x_out, c_out):
        dy = 2*(dp-1) + p_in - p_out,  dx = x_in - x_out
        entry = w[dy+1, dx+1, c_in, c_out] if |dy| <= 1 and |dx| <= 1 else 0
    which folds the 3x3 y/x taps AND the x zero-padding into a single matmul per conv.
    """
    kh, kw, cin, cout = w_hwio.shape
    p_in = jnp.arange(P).reshape(P, 1, 1, 1)
    x_in = jnp.arange(W).reshape(1, W, 1, 1)
    p_out = jnp.arange(P).reshape(1, 1, P, 1)
    x_out = jnp.arange(W).reshape(1, 1, 1, W)
    dx = jnp.broadcast_to(x_in - x_out, (P, W, P, W))
    mats = []
    for dp in range(3):
        dy = jnp.broadcast_to(2 * (dp - 1) + p_in - p_out, (P, W, P, W))
        valid = (jnp.abs(dy) <= 1) & (jnp.abs(dx) <= 1)
        dyc = jnp.clip(dy + 1, 0, kh - 1)
        dxc = jnp.clip(dx + 1, 0, kw - 1)
        t = w_hwio[dyc, dxc]                                  # (P,W,P,W,Cin,Cout)
        t = t * valid[..., None, None].astype(w_hwio.dtype)
        t = jnp.transpose(t, (0, 1, 4, 2, 3, 5))              # (P,W,Cin,P,W,Cout)
        mats.append(t.reshape(P * W * cin, P * W * cout))
    return jnp.concatenate(mats, axis=0)                      # (3*P*W*Cin, P*W*Cout)


@jax.jit
def hin_res_block(x_nchw, w1_oihw, b1, w2_oihw, b2, gamma, beta):
    """PyTorch-facing wrapper: NCHW input / OIHW weights, NCHW output."""
    N, C, H, W = x_nchw.shape
    assert H % P == 0, "H must be even for two-row lane packing"
    Hp = H // P
    R, L = N * Hp, P * W * C
    Ch = C // 2

    # NCHW -> NHWC -> lane-dense slab: rows = (n, y//2), lanes = (y%2, x, c).
    x2d = (jnp.transpose(x_nchw, (0, 2, 3, 1))
           .reshape(N, Hp, P, W, C)
           .reshape(R, L))

    # Conv weights: OIHW -> HWIO -> stacked block-Toeplitz, bf16 for the MXU.
    w1_hwio = jnp.transpose(w1_oihw, (2, 3, 1, 0))
    w2_hwio = jnp.transpose(w2_oihw, (2, 3, 1, 0))
    t1 = _build_toeplitz_packed(w1_hwio, W).astype(jnp.bfloat16)   # (3L, L)
    t2 = _build_toeplitz_packed(w2_hwio, W).astype(jnp.bfloat16)   # (3L, L)

    # Biases / affine params tiled over (p, x) so lane (p*W*C + x*C + c) holds value c.
    b1t = jnp.tile(b1, P * W).reshape(1, L).astype(jnp.float32)
    b2t = jnp.tile(b2, P * W).reshape(1, L).astype(jnp.float32)
    g_full = jnp.concatenate([gamma, jnp.ones((C - Ch,), gamma.dtype)])
    bt_full = jnp.concatenate([beta, jnp.zeros((C - Ch,), beta.dtype)])
    g_t = jnp.tile(g_full, P * W).reshape(1, L).astype(jnp.float32)
    bt_t = jnp.tile(bt_full, P * W).reshape(1, L).astype(jnp.float32)

    # Instance-norm reduction / broadcast selector matrices (0/1, exact in f32).
    rows = jnp.arange(R) // Hp
    rsel = (rows[None, :] == jnp.arange(N)[:, None]).astype(jnp.float32)    # (N, R)
    rselT = rsel.T                                                          # (R, N)
    lanes = jnp.arange(L)
    csum = (lanes[:, None] % C == lanes[None, :] % C).astype(jnp.float32)   # (L, L)
    zero = jnp.zeros_like(csum)
    csum2 = jnp.block([[csum, zero], [zero, csum]])                         # (2L, 2L)

    kernel = _make_kernel(N, Hp, W, C)
    out2d = pl.pallas_call(
        kernel,
        out_shape=jax.ShapeDtypeStruct((R, L), x2d.dtype),
        grid_spec=pltpu.PrefetchScalarGridSpec(
            num_scalar_prefetch=0,
            grid=(1,),                               # whole batch in one step (toy size)
            in_specs=[
                pl.BlockSpec((R, L), lambda i: (0, 0)),            # x
                pl.BlockSpec((3 * L, L), lambda i: (0, 0)),        # t1
                pl.BlockSpec((1, L), lambda i: (0, 0)),            # b1
                pl.BlockSpec((3 * L, L), lambda i: (0, 0)),        # t2
                pl.BlockSpec((1, L), lambda i: (0, 0)),            # b2
                pl.BlockSpec((1, L), lambda i: (0, 0)),            # gamma (tiled)
                pl.BlockSpec((1, L), lambda i: (0, 0)),            # beta (tiled)
                pl.BlockSpec((N, R), lambda i: (0, 0)),            # rsel
                pl.BlockSpec((R, N), lambda i: (0, 0)),            # rselT
                pl.BlockSpec((2 * L, 2 * L), lambda i: (0, 0)),    # csum2
            ],
            out_specs=pl.BlockSpec((R, L), lambda i: (0, 0)),
        ),
        compiler_params=pltpu.CompilerParams(
            dimension_semantics=("arbitrary",)),
    )(x2d, t1, b1t, t2, b2t, g_t, bt_t, rsel, rselT, csum2)

    return jnp.transpose(
        out2d.reshape(N, Hp, P, W, C).reshape(N, H, W, C), (0, 3, 1, 2))


def ref_forward_nchw(x, w1, b1, w2, b2, gamma, beta):
    """Pure-JAX f32 reference mirroring the torch HinResBlock.forward (NCHW/OIHW)."""
    def conv(z, w, b):
        return lax.conv_general_dilated(
            z, w, (1, 1), 'SAME',
            dimension_numbers=('NCHW', 'OIHW', 'NCHW')) + b[None, :, None, None]

    def lrelu(z):
        return jnp.where(z >= 0, z, RELU_SLOPE * z)

    resi = lrelu(conv(x, w1, b1))
    C = x.shape[1]
    Ch = C // 2
    h1 = resi[:, :Ch]
    mean = h1.mean(axis=(2, 3), keepdims=True)
    var = ((h1 - mean) ** 2).mean(axis=(2, 3), keepdims=True)
    h1n = (h1 - mean) * lax.rsqrt(var + EPS)
    h1n = h1n * gamma[None, :, None, None] + beta[None, :, None, None]
    feat = jnp.concatenate([h1n, resi[:, Ch:]], axis=1)
    resi = lrelu(conv(feat, w2, b2))
    return x + resi


if __name__ == "__main__":
    # in_size = out_size = 4 (residual add requires in_size == out_size)
    N, C, H, W = 2, 4, 16, 16
    key = jax.random.PRNGKey(0)
    ks = jax.random.split(key, 7)

    x = jax.random.normal(ks[0], (N, C, H, W), jnp.float32)
    w1 = jax.random.normal(ks[1], (C, C, 3, 3), jnp.float32) * 0.1   # conv_1.weight (OIHW)
    b1 = jax.random.normal(ks[2], (C,), jnp.float32) * 0.1           # conv_1.bias
    w2 = jax.random.normal(ks[3], (C, C, 3, 3), jnp.float32) * 0.1   # conv_2.weight (OIHW)
    b2 = jax.random.normal(ks[4], (C,), jnp.float32) * 0.1           # conv_2.bias
    gamma = 1.0 + 0.1 * jax.random.normal(ks[5], (C // 2,), jnp.float32)  # norm.weight
    beta = 0.1 * jax.random.normal(ks[6], (C // 2,), jnp.float32)         # norm.bias

    out = hin_res_block(x, w1, b1, w2, b2, gamma, beta)
    out = jax.block_until_ready(out)

    ref = ref_forward_nchw(x, w1, b1, w2, b2, gamma, beta)
    # bf16 MXU conv operands (f32 accumulation / f32 elementwise & stats) => ~1e-2 drift.
    np.testing.assert_allclose(np.asarray(out), np.asarray(ref),
                               rtol=5e-2, atol=5e-2)
    print("KERNEL_OK")
</pallas_src>

<mosaic_0001>
module attributes {stable_mosaic.version = 11 : i64} {
  func.func @kernel(%arg0: i32, %arg1: memref<16x128xf32, #tpu.memory_space<vmem>>, %arg2: memref<384x128xbf16, #tpu.memory_space<vmem>>, %arg3: memref<1x128xf32, #tpu.memory_space<vmem>>, %arg4: memref<384x128xbf16, #tpu.memory_space<vmem>>, %arg5: memref<1x128xf32, #tpu.memory_space<vmem>>, %arg6: memref<1x128xf32, #tpu.memory_space<vmem>>, %arg7: memref<1x128xf32, #tpu.memory_space<vmem>>, %arg8: memref<2x16xf32, #tpu.memory_space<vmem>>, %arg9: memref<16x2xf32, #tpu.memory_space<vmem>>, %arg10: memref<256x256xf32, #tpu.memory_space<vmem>>, %arg11: memref<16x128xf32, #tpu.memory_space<vmem>>) attributes {dimension_semantics = [#tpu.dimension_semantics<arbitrary>], iteration_bounds = array<i64: 1>, scalar_prefetch = 0 : i64, scratch_operands = 0 : i64, tpu.core_type = #tpu.core_type<tc>, window_params = [{pipeline_mode = #tpu.pipeline_mode<synchronous>, transform_indices = @transform_0, window_bounds = array<i64: 16, 128>}, {pipeline_mode = #tpu.pipeline_mode<synchronous>, transform_indices = @transform_1, window_bounds = array<i64: 384, 128>}, {pipeline_mode = #tpu.pipeline_mode<synchronous>, transform_indices = @transform_2, window_bounds = array<i64: 1, 128>}, {pipeline_mode = #tpu.pipeline_mode<synchronous>, transform_indices = @transform_3, window_bounds = array<i64: 384, 128>}, {pipeline_mode = #tpu.pipeline_mode<synchronous>, transform_indices = @transform_4, window_bounds = array<i64: 1, 128>}, {pipeline_mode = #tpu.pipeline_mode<synchronous>, transform_indices = @transform_5, window_bounds = array<i64: 1, 128>}, {pipeline_mode = #tpu.pipeline_mode<synchronous>, transform_indices = @transform_6, window_bounds = array<i64: 1, 128>}, {pipeline_mode = #tpu.pipeline_mode<synchronous>, transform_indices = @transform_7, window_bounds = array<i64: 2, 16>}, {pipeline_mode = #tpu.pipeline_mode<synchronous>, transform_indices = @transform_8, window_bounds = array<i64: 16, 2>}, {pipeline_mode = #tpu.pipeline_mode<synchronous>, transform_indices = @transform_9, window_bounds = array<i64: 256, 256>}, {pipeline_mode = #tpu.pipeline_mode<synchronous>, transform_indices = @transform_10, window_bounds = array<i64: 16, 128>}]} {
    %c0 = arith.constant 0 : index
    %c0_0 = arith.constant 0 : index
    %0 = vector.load %arg1[%c0, %c0_0] : memref<16x128xf32, #tpu.memory_space<vmem>>, vector<16x128xf32>
    %1 = tpu.iota {dimensions = array<i32: 0>} : vector<16x1xi32>
    %c8_i32 = arith.constant 8 : i32
    %c0_i32 = arith.constant 0 : i32
    %2 = arith.cmpi eq, %c8_i32, %c0_i32 : i32
    %c1_i32 = arith.constant 1 : i32
    %3 = arith.select %2, %c1_i32, %c8_i32 : i32
    %4 = vector.broadcast %3 : i32 to vector<16x1xi32>
    %5 = arith.remsi %1, %4 : vector<16x1xi32>
    %c0_i32_1 = arith.constant 0 : i32
    %6 = vector.broadcast %c0_i32_1 : i32 to vector<16x1xi32>
    %7 = arith.cmpi ne, %5, %6 : vector<16x1xi32>
    %c0_i32_2 = arith.constant 0 : i32
    %8 = vector.broadcast %c0_i32_2 : i32 to vector<16x1xi32>
    %9 = arith.cmpi slt, %5, %8 : vector<16x1xi32>
    %c0_i32_3 = arith.constant 0 : i32
    %10 = arith.cmpi slt, %3, %c0_i32_3 : i32
    %11 = vector.broadcast %10 : i1 to vector<16x1xi1>
    %12 = vector.broadcast %11 : vector<16x1xi1> to vector<16x1xi1>
    %13 = arith.xori %9, %12 : vector<16x1xi1>
    %14 = arith.andi %13, %7 : vector<16x1xi1>
    %15 = vector.broadcast %3 : i32 to vector<16x1xi32>
    %16 = arith.addi %5, %15 : vector<16x1xi32>
    %17 = arith.select %14, %16, %5 : vector<16x1xi1>, vector<16x1xi32>
    %c1_i32_4 = arith.constant 1 : i32
    %18 = vector.broadcast %c1_i32_4 : i32 to vector<16x1xi32>
    %19 = arith.cmpi sge, %17, %18 : vector<16x1xi32>
    %c7_i32 = arith.constant 7 : i32
    %20 = vector.broadcast %c7_i32 : i32 to vector<16x1xi32>
    %21 = arith.cmpi slt, %17, %20 : vector<16x1xi32>
    %22 = tpu.iota {dimensions = array<i32: 1>} : vector<1x128xi32>
    %c4_i32 = arith.constant 4 : i32
    %c0_i32_5 = arith.constant 0 : i32
    %23 = arith.cmpi eq, %c4_i32, %c0_i32_5 : i32
    %c1_i32_6 = arith.constant 1 : i32
    %24 = arith.select %23, %c1_i32_6, %c4_i32 : i32
    %25 = vector.broadcast %24 : i32 to vector<1x128xi32>
    %26 = arith.remsi %22, %25 : vector<1x128xi32>
    %c0_i32_7 = arith.constant 0 : i32
    %27 = vector.broadcast %c0_i32_7 : i32 to vector<1x128xi32>
    %28 = arith.cmpi ne, %26, %27 : vector<1x128xi32>
    %c0_i32_8 = arith.constant 0 : i32
    %29 = vector.broadcast %c0_i32_8 : i32 to vector<1x128xi32>
    %30 = arith.cmpi slt, %26, %29 : vector<1x128xi32>
    %c0_i32_9 = arith.constant 0 : i32
    %31 = arith.cmpi slt, %24, %c0_i32_9 : i32
    %32 = vector.broadcast %31 : i1 to vector<1x128xi1>
    %33 = vector.broadcast %32 : vector<1x128xi1> to vector<1x128xi1>
    %34 = arith.xori %30, %33 : vector<1x128xi1>
    %35 = arith.andi %34, %28 : vector<1x128xi1>
    %36 = vector.broadcast %24 : i32 to vector<1x128xi32>
    %37 = arith.addi %26, %36 : vector<1x128xi32>
    %38 = arith.select %35, %37, %26 : vector<1x128xi1>, vector<1x128xi32>
    %c2_i32 = arith.constant 2 : i32
    %39 = vector.broadcast %c2_i32 : i32 to vector<1x128xi32>
    %40 = arith.cmpi slt, %38, %39 : vector<1x128xi32>
    %c1_i32_10 = arith.constant 1 : i32
    %41 = tpu.dynamic_rotate %0 by %c1_i32_10 dim 0 : vector<16x128xf32>, i32 -> vector<16x128xf32>
    %cst = arith.constant 0.000000e+00 : f32
    %42 = vector.shape_cast %19 : vector<16x1xi1> to vector<16x1xi1>
    %43 = vector.broadcast %42 : vector<16x1xi1> to vector<16x128xi1>
    %44 = vector.broadcast %cst : f32 to vector<16x128xf32>
    %45 = arith.select %43, %41, %44 : vector<16x128xi1>, vector<16x128xf32>
    %c15_i32 = arith.constant 15 : i32
    %46 = tpu.dynamic_rotate %0 by %c15_i32 dim 0 : vector<16x128xf32>, i32 -> vector<16x128xf32>
    %cst_11 = arith.constant 0.000000e+00 : f32
    %47 = vector.shape_cast %21 : vector<16x1xi1> to vector<16x1xi1>
    %48 = vector.broadcast %47 : vector<16x1xi1> to vector<16x128xi1>
    %49 = vector.broadcast %cst_11 : f32 to vector<16x128xf32>
    %50 = arith.select %48, %46, %49 : vector<16x128xi1>, vector<16x128xf32>
    %51 = tpu.concatenate %45, %0, %50 in 1 : vector<16x128xf32>, vector<16x128xf32>, vector<16x128xf32> -> vector<16x384xf32>
    %52 = arith.truncf %51 : vector<16x384xf32> to vector<16x384xbf16>
    %c0_12 = arith.constant 0 : index
    %c0_13 = arith.constant 0 : index
    %53 = vector.load %arg2[%c0_12, %c0_13] : memref<384x128xbf16, #tpu.memory_space<vmem>>, vector<384x128xbf16>
    %cst_14 = arith.constant dense<0.000000e+00> : vector<16x128xf32>
    %54 = tpu.matmul %52, %53, %cst_14 {dimension_numbers = #tpu.dot_dimension_numbers<[1], [0], [0], [1], [0, 0, 1, 1], [], []>} : vector<16x384xbf16>, vector<384x128xbf16>, vector<16x128xf32> -> vector<16x128xf32>
    %c0_15 = arith.constant 0 : index
    %c0_16 = arith.constant 0 : index
    %55 = vector.load %arg3[%c0_15, %c0_16] : memref<1x128xf32, #tpu.memory_space<vmem>>, vector<1x128xf32>
    %56 = vector.broadcast %55 : vector<1x128xf32> to vector<16x128xf32>
    %57 = arith.addf %54, %56 : vector<16x128xf32>
    %cst_17 = arith.constant 0.000000e+00 : f32
    %58 = vector.broadcast %cst_17 : f32 to vector<16x128xf32>
    %59 = arith.cmpf oge, %57, %58 : vector<16x128xf32>
    %cst_18 = arith.constant 2.000000e-01 : f32
    %60 = vector.broadcast %cst_18 : f32 to vector<16x128xf32>
    %61 = arith.mulf %60, %57 : vector<16x128xf32>
    %62 = arith.select %59, %57, %61 : vector<16x128xi1>, vector<16x128xf32>
    %63 = arith.mulf %62, %62 : vector<16x128xf32>
    %64 = tpu.concatenate %62, %63 in 1 : vector<16x128xf32>, vector<16x128xf32> -> vector<16x256xf32>
    %c0_19 = arith.constant 0 : index
    %c0_20 = arith.constant 0 : index
    %65 = vector.load %arg8[%c0_19, %c0_20] : memref<2x16xf32, #tpu.memory_space<vmem>>, vector<2x16xf32>
    %cst_21 = arith.constant dense<0.000000e+00> : vector<2x256xf32>
    %66 = tpu.matmul %65, %64, %cst_21 {dimension_numbers = #tpu.dot_dimension_numbers<[1], [0], [0], [1], [0, 0, 1, 1], [], []>} : vector<2x16xf32>, vector<16x256xf32>, vector<2x256xf32> -> vector<2x256xf32>
    %c0_22 = arith.constant 0 : index
    %c0_23 = arith.constant 0 : index
    %67 = vector.load %arg10[%c0_22, %c0_23] : memref<256x256xf32, #tpu.memory_space<vmem>>, vector<256x256xf32>
    %cst_24 = arith.constant dense<0.000000e+00> : vector<2x256xf32>
    %68 = tpu.matmul %66, %67, %cst_24 {dimension_numbers = #tpu.dot_dimension_numbers<[1], [0], [0], [1], [0, 0, 1, 1], [], []>} : vector<2x256xf32>, vector<256x256xf32>, vector<2x256xf32> -> vector<2x256xf32>
    %cst_25 = arith.constant 3.906250e-03 : f32
    %69 = vector.broadcast %cst_25 : f32 to vector<2x256xf32>
    %70 = arith.mulf %68, %69 : vector<2x256xf32>
    %71 = vector.extract_strided_slice %70 {offsets = [0, 0], sizes = [2, 128], strides = [1, 1]} : vector<2x256xf32> to vector<2x128xf32>
    %72 = vector.extract_strided_slice %70 {offsets = [0, 128], sizes = [2, 128], strides = [1, 1]} : vector<2x256xf32> to vector<2x128xf32>
    %73 = arith.mulf %71, %71 : vector<2x128xf32>
    %74 = arith.subf %72, %73 : vector<2x128xf32>
    %cst_26 = arith.constant 0.000000e+00 : f32
    %75 = vector.broadcast %cst_26 : f32 to vector<2x128xf32>
    %76 = arith.maximumf %74, %75 : vector<2x128xf32>
    %cst_27 = arith.constant 9.99999974E-6 : f32
    %77 = vector.broadcast %cst_27 : f32 to vector<2x128xf32>
    %78 = arith.addf %76, %77 : vector<2x128xf32>
    %79 = math.rsqrt %78 : vector<2x128xf32>
    %80 = tpu.concatenate %71, %79 in 1 : vector<2x128xf32>, vector<2x128xf32> -> vector<2x256xf32>
    %c0_28 = arith.constant 0 : index
    %c0_29 = arith.constant 0 : index
    %81 = vector.load %arg9[%c0_28, %c0_29] : memref<16x2xf32, #tpu.memory_space<vmem>>, vector<16x2xf32>
    %cst_30 = arith.constant dense<0.000000e+00> : vector<16x256xf32>
    %82 = tpu.matmul %81, %80, %cst_30 {dimension_numbers = #tpu.dot_dimension_numbers<[1], [0], [0], [1], [0, 0, 1, 1], [], []>} : vector<16x2xf32>, vector<2x256xf32>, vector<16x256xf32> -> vector<16x256xf32>
    %83 = vector.extract_strided_slice %82 {offsets = [0, 0], sizes = [16, 128], strides = [1, 1]} : vector<16x256xf32> to vector<16x128xf32>
    %84 = vector.extract_strided_slice %82 {offsets = [0, 128], sizes = [16, 128], strides = [1, 1]} : vector<16x256xf32> to vector<16x128xf32>
    %85 = arith.subf %62, %83 : vector<16x128xf32>
    %86 = arith.mulf %85, %84 : vector<16x128xf32>
    %c0_31 = arith.constant 0 : index
    %c0_32 = arith.constant 0 : index
    %87 = vector.load %arg6[%c0_31, %c0_32] : memref<1x128xf32, #tpu.memory_space<vmem>>, vector<1x128xf32>
    %88 = vector.broadcast %87 : vector<1x128xf32> to vector<16x128xf32>
    %89 = arith.mulf %86, %88 : vector<16x128xf32>
    %c0_33 = arith.constant 0 : index
    %c0_34 = arith.constant 0 : index
    %90 = vector.load %arg7[%c0_33, %c0_34] : memref<1x128xf32, #tpu.memory_space<vmem>>, vector<1x128xf32>
    %91 = vector.broadcast %90 : vector<1x128xf32> to vector<16x128xf32>
    %92 = arith.addf %89, %91 : vector<16x128xf32>
    %93 = vector.shape_cast %40 : vector<1x128xi1> to vector<1x128xi1>
    %94 = vector.broadcast %93 : vector<1x128xi1> to vector<16x128xi1>
    %95 = arith.select %94, %92, %62 : vector<16x128xi1>, vector<16x128xf32>
    %c1_i32_35 = arith.constant 1 : i32
    %96 = tpu.dynamic_rotate %95 by %c1_i32_35 dim 0 : vector<16x128xf32>, i32 -> vector<16x128xf32>
    %cst_36 = arith.constant 0.000000e+00 : f32
    %97 = vector.shape_cast %19 : vector<16x1xi1> to vector<16x1xi1>
    %98 = vector.broadcast %97 : vector<16x1xi1> to vector<16x128xi1>
    %99 = vector.broadcast %cst_36 : f32 to vector<16x128xf32>
    %100 = arith.select %98, %96, %99 : vector<16x128xi1>, vector<16x128xf32>
    %c15_i32_37 = arith.constant 15 : i32
    %101 = tpu.dynamic_rotate %95 by %c15_i32_37 dim 0 : vector<16x128xf32>, i32 -> vector<16x128xf32>
    %cst_38 = arith.constant 0.000000e+00 : f32
    %102 = vector.shape_cast %21 : vector<16x1xi1> to vector<16x1xi1>
    %103 = vector.broadcast %102 : vector<16x1xi1> to vector<16x128xi1>
    %104 = vector.broadcast %cst_38 : f32 to vector<16x128xf32>
    %105 = arith.select %103, %101, %104 : vector<16x128xi1>, vector<16x128xf32>
    %106 = tpu.concatenate %100, %95, %105 in 1 : vector<16x128xf32>, vector<16x128xf32>, vector<16x128xf32> -> vector<16x384xf32>
    %107 = arith.truncf %106 : vector<16x384xf32> to vector<16x384xbf16>
    %c0_39 = arith.constant 0 : index
    %c0_40 = arith.constant 0 : index
    %108 = vector.load %arg4[%c0_39, %c0_40] : memref<384x128xbf16, #tpu.memory_space<vmem>>, vector<384x128xbf16>
    %cst_41 = arith.constant dense<0.000000e+00> : vector<16x128xf32>
    %109 = tpu.matmul %107, %108, %cst_41 {dimension_numbers = #tpu.dot_dimension_numbers<[1], [0], [0], [1], [0, 0, 1, 1], [], []>} : vector<16x384xbf16>, vector<384x128xbf16>, vector<16x128xf32> -> vector<16x128xf32>
    %c0_42 = arith.constant 0 : index
    %c0_43 = arith.constant 0 : index
    %110 = vector.load %arg5[%c0_42, %c0_43] : memref<1x128xf32, #tpu.memory_space<vmem>>, vector<1x128xf32>
    %111 = vector.broadcast %110 : vector<1x128xf32> to vector<16x128xf32>
    %112 = arith.addf %109, %111 : vector<16x128xf32>
    %cst_44 = arith.constant 0.000000e+00 : f32
    %113 = vector.broadcast %cst_44 : f32 to vector<16x128xf32>
    %114 = arith.cmpf oge, %112, %113 : vector<16x128xf32>
    %cst_45 = arith.constant 2.000000e-01 : f32
    %115 = vector.broadcast %cst_45 : f32 to vector<16x128xf32>
    %116 = arith.mulf %115, %112 : vector<16x128xf32>
    %117 = arith.select %114, %112, %116 : vector<16x128xi1>, vector<16x128xf32>
    %118 = arith.addf %0, %117 : vector<16x128xf32>
    %c0_46 = arith.constant 0 : index
    %c0_47 = arith.constant 0 : index
    %119 = vector.load %arg11[%c0_46, %c0_47] : memref<16x128xf32, #tpu.memory_space<vmem>>, vector<16x128xf32>
    tpu.vector_store %arg11[%c0_46, %c0_47], %118 {strides = array<i32>} : memref<16x128xf32, #tpu.memory_space<vmem>>, vector<16x128xf32>,
    return
  }
  func.func @transform_0(%arg0: i32) -> (i32, i32) {
    %c0_i32 = arith.constant 0 : i32
    %c0_i32_0 = arith.constant 0 : i32
    %c0_i32_1 = arith.constant 0 : i32
    return %c0_i32, %c0_i32_0 : i32, i32
  }
  func.func @transform_1(%arg0: i32) -> (i32, i32) {
    %c0_i32 = arith.constant 0 : i32
    %c0_i32_0 = arith.constant 0 : i32
    %c0_i32_1 = arith.constant 0 : i32
    return %c0_i32, %c0_i32_0 : i32, i32
  }
  func.func @transform_2(%arg0: i32) -> (i32, i32) {
    %c0_i32 = arith.constant 0 : i32
    %c0_i32_0 = arith.constant 0 : i32
    %c0_i32_1 = arith.constant 0 : i32
    return %c0_i32, %c0_i32_0 : i32, i32
  }
  func.func @transform_3(%arg0: i32) -> (i32, i32) {
    %c0_i32 = arith.constant 0 : i32
    %c0_i32_0 = arith.constant 0 : i32
    %c0_i32_1 = arith.constant 0 : i32
    return %c0_i32, %c0_i32_0 : i32, i32
  }
  func.func @transform_4(%arg0: i32) -> (i32, i32) {
    %c0_i32 = arith.constant 0 : i32
    %c0_i32_0 = arith.constant 0 : i32
    %c0_i32_1 = arith.constant 0 : i32
    return %c0_i32, %c0_i32_0 : i32, i32
  }
  func.func @transform_5(%arg0: i32) -> (i32, i32) {
    %c0_i32 = arith.constant 0 : i32
    %c0_i32_0 = arith.constant 0 : i32
    %c0_i32_1 = arith.constant 0 : i32
    return %c0_i32, %c0_i32_0 : i32, i32
  }
  func.func @transform_6(%arg0: i32) -> (i32, i32) {
    %c0_i32 = arith.constant 0 : i32
    %c0_i32_0 = arith.constant 0 : i32
    %c0_i32_1 = arith.constant 0 : i32
    return %c0_i32, %c0_i32_0 : i32, i32
  }
  func.func @transform_7(%arg0: i32) -> (i32, i32) {
    %c0_i32 = arith.constant 0 : i32
    %c0_i32_0 = arith.constant 0 : i32
    %c0_i32_1 = arith.constant 0 : i32
    return %c0_i32, %c0_i32_0 : i32, i32
  }
  func.func @transform_8(%arg0: i32) -> (i32, i32) {
    %c0_i32 = arith.constant 0 : i32
    %c0_i32_0 = arith.constant 0 : i32
    %c0_i32_1 = arith.constant 0 : i32
    return %c0_i32, %c0_i32_0 : i32, i32
  }
  func.func @transform_9(%arg0: i32) -> (i32, i32) {
    %c0_i32 = arith.constant 0 : i32
    %c0_i32_0 = arith.constant 0 : i32
    %c0_i32_1 = arith.constant 0 : i32
    return %c0_i32, %c0_i32_0 : i32, i32
  }
  func.func @transform_10(%arg0: i32) -> (i32, i32) {
    %c0_i32 = arith.constant 0 : i32
    %c0_i32_0 = arith.constant 0 : i32
    %c0_i32_1 = arith.constant 0 : i32
    return %c0_i32, %c0_i32_0 : i32, i32
  }
}

</mosaic_0001>

<bundles_post_ra>
// kernel: tile.38
= control target key start
LH: loop header
LB: loop body
LE: loop exit
PB: predicated region body
PF: predicated region fallthrough
CT: control target
= control target key end

     0   :  { %s40_s0 = inlined_call_operand.vmem [shape: f32[4], index: 0, kind: input, shape index: {}]   ;;  %s41_s1 = inlined_call_operand.vmem [shape: f32[32,4], index: 1, kind: output, shape index: {}]  }
   0x1   :  { %v4_v0 = vld [vmem:[%s40_s0] ss:$0 sm:$0xff] }
   0x2   :  { %5 = vst [vmem:[%s41_s1] sm:$0xff] %v4_v0 }
   0x3   :  { %12 = vst [vmem:[%s41_s1 + $0x8] sm:$0xff] %v4_v0 }
   0x4   :  { %13 = vst [vmem:[%s41_s1 + $0x10] sm:$0xff] %v4_v0 }
   0x5   :  { %14 = vst [vmem:[%s41_s1 + $0x18] sm:$0xff] %v4_v0 }

// kernel: tile.23
= control target key start
LH: loop header
LB: loop body
LE: loop exit
PB: predicated region body
PF: predicated region fallthrough
CT: control target
= control target key end

     0   :  { %2 = vsyncpa [#allocation1], 0  ;;  %s57_s8 = smov [#allocation0]   ;;  %s83_s0 = inlined_call_operand.hbm [shape: f32[4], index: 0, kind: input, shape index: {}]   ;;  %s84_s1 = inlined_call_operand.vmem [shape: f32[32,4], index: 1, kind: output, shape index: {}]  }
   0x1   :  { %s8_s0 = sshll.u32 %s83_s0, 4  ;;  %s10_s9 = sshll.u32 %s57_s8, 4  ;;  %s9_s0 = int_to_ptr.hbm [resolvable:$true] %s8_s0  ;;  %s11_s9 = int_to_ptr.vmem [resolvable:$true] %s10_s9 }
   0x2   :  { %13 = dma.hbm_to_vmem [thread:$0]  %s9_s0, 16, %s11_s9, [#allocation1]  }
   0x3   :  { %55 = dma.done.wait [#allocation1], 16  }
   0x4   :  { %56 = vsyncadd [#allocation1], 4294967280  ;;  %v18_v0 = vld [vmem:[#allocation0] ss:$0 sm:$0xff] }
   0x5   :  { %19 = vst [vmem:[%s84_s1] sm:$0xff] %v18_v0 }
   0x6   :  { %27 = vst [vmem:[%s84_s1 + $0x8] sm:$0xff] %v18_v0 }
   0x7   :  { %28 = vst [vmem:[%s84_s1 + $0x10] sm:$0xff] %v18_v0 }
   0x8   :  { %29 = vst [vmem:[%s84_s1 + $0x18] sm:$0xff] %v18_v0 }
   0x9   :  { %26 = vsyncpa [#allocation1], 1 }

// kernel: tile.39
= control target key start
LH: loop header
LB: loop body
LE: loop exit
PB: predicated region body
PF: predicated region fallthrough
CT: control target
= control target key end

     0   :  { %s259_s10 = smov 124   ;;  %s260_s11 = smov 116   ;;  %vm3_vm0 = vcmask 31744   ;;  %vm9_vm1 = vcmask 1048544   ;;  %vm15_vm2 = vcmask 1015744   ;;  %vm21_vm3 = vcmask 982944   ;;  %s399_s0 = inlined_call_operand.vmem [shape: f32[32,4], index: 0, kind: input, shape index: {}]   ;;  %s400_s1 = inlined_call_operand.vmem [shape: f32[1,128], index: 1, kind: output, shape index: {}]  }
   0x1   :  { %v197_v0 = vld [vmem:[%s399_s0 + $0x1f] sm:$0x1]   ;;  %v199_v1 = vld [vmem:[%s399_s0 + $0x1d] sm:$0x1]   ;;  %v201_v2 = vld [vmem:[%s399_s0 + $0x1b] sm:$0x1]  }
   0x2   :  { %7 = vrot.lane.b32.xlu0 %v197_v0, %s259_s10  ;;  %19 = vrot.lane.b32.xlu1 %v199_v1, %s260_s11  ;;  %s261_s14 = smov 108   ;;  %v198_v3 = vld [vmem:[%s399_s0 + $0x1e] sm:$0x1]   ;;  %v200_v4 = vld [vmem:[%s399_s0 + $0x1c] sm:$0x1]   ;;  %s262_s19 = smov 120  }
   0x3   :  { %31 = vrot.lane.b32.xlu2 %v201_v2, %s261_s14  ;;  %s263_s20 = smov 112   ;;  %v202_v5 = vld [vmem:[%s399_s0 + $0x1a] sm:$0x1]   ;;  %s264_s23 = smov 104   ;;  %v203_v6 = vld [vmem:[%s399_s0 + $0x19] sm:$0x1]  }
   0x4   :  { %v204_v7 = vld [vmem:[%s399_s0 + $0x18] sm:$0x1]   ;;  %s265_s28 = smov 100   ;;  %s266_s29 = smov 96   ;;  %v205_v8 = vld [vmem:[%s399_s0 + $0x17] sm:$0x1]  }
   0x5   :  { %s267_s3 = smov 92   ;;  %v206_v9 = vld [vmem:[%s399_s0 + $0x16] sm:$0x1]   ;;  %v207_v10 = vld [vmem:[%s399_s0 + $0x15] sm:$0x1]   ;;  %s268_s8 = smov 88  }
   0x6   :  { %s269_s9 = smov 84   ;;  %v208_v11 = vld [vmem:[%s399_s0 + $0x14] sm:$0x1]   ;;  %s270_s12 = smov 80   ;;  %v209_v12 = vld [vmem:[%s399_s0 + $0x13] sm:$0x1]  }
   0x7   :  { %v210_v13 = vld [vmem:[%s399_s0 + $0x12] sm:$0x1]   ;;  %s271_s17 = smov 76   ;;  %s272_s18 = smov 72   ;;  %v211_v14 = vld [vmem:[%s399_s0 + $0x11] sm:$0x1]  }
   0x8   :  { %s273_s21 = smov 68   ;;  %v212_v15 = vld [vmem:[%s399_s0 + $0x10] sm:$0x1]   ;;  %v213_v16 = vld [vmem:[%s399_s0 + $0xf] sm:$0x1]   ;;  %s274_s26 = smov 64  }
   0x9   :  { %s275_s27 = smov 60   ;;  %v214_v17 = vld [vmem:[%s399_s0 + $0xe] sm:$0x1]   ;;  %s276_s30 = smov 56   ;;  %v215_v18 = vld [vmem:[%s399_s0 + $0xd] sm:$0x1]  }
   0xa   :  { %13 = vrot.lane.b32.xlu0 %v198_v3, %s262_s19  ;;  %25 = vrot.lane.b32.xlu1 %v200_v4, %s263_s20  ;;  %v216_v19 = vld [vmem:[%s399_s0 + $0xc] sm:$0x1]   ;;  %s277_s6 = smov 52   ;;  %s278_s7 = smov 48   ;;  %v217_v20 = vld [vmem:[%s399_s0 + $0xb] sm:$0x1]  }
   0xb   :  { %37 = vrot.lane.b32.xlu2 %v202_v5, %s264_s23  ;;  %s279_s10 = smov 44   ;;  %v218_v21 = vld [vmem:[%s399_s0 + $0xa] sm:$0x1]   ;;  %v219_v22 = vld [vmem:[%s399_s0 + $0x9] sm:$0x1]   ;;  %s280_s15 = smov 40  }
   0xc   :  { %s281_s16 = smov 36   ;;  %v220_v23 = vld [vmem:[%s399_s0 + $0x8] sm:$0x1]   ;;  %s282_s19 = smov 32   ;;  %v221_v24 = vld [vmem:[%s399_s0 + $0x7] sm:$0x1]  }
   0xd   :  { %v222_v25 = vld [vmem:[%s399_s0 + $0x6] sm:$0x1]   ;;  %s283_s24 = smov 28   ;;  %s284_s25 = smov 24   ;;  %v223_v26 = vld [vmem:[%s399_s0 + $0x5] sm:$0x1]  }
   0xe   :  { %v224_v27 = vld [vmem:[%s399_s0 + $0x4] sm:$0x1]   ;;  %v225_v28 = vld [vmem:[%s399_s0 + $0x3] sm:$0x1]   ;;  %s286_s4 = smov 16   ;;  %s287_s5 = smov 12  }
   0xf   :  { %v226_v29 = vld [vmem:[%s399_s0 + $0x2] sm:$0x1]   ;;  %v227_v30 = vld [vmem:[%s399_s0 + $0x1] sm:$0x1]   ;;  %s289_s11 = smov 4   ;;  %vm27_vm4 = vcmask 950144  }
  0x10   :  { %v2_v31 = vld [vmem:[%s399_s0] sm:$0x1]   ;;  %vm33_vm5 = vcmask 917344   ;;  %vm39_vm6 = vcmask 884544   ;;  %vm45_vm7 = vcmask 851744   ;;  %vm51_vm8 = vcmask 818944  }
  0x11   :  { %4 = vst.msk [vmem:[#allocation0] sm:$0x1] %vm3_vm0, %v2_v31   ;;  %vm57_vm9 = vcmask 786144   ;;  %vm63_vm10 = vcmask 753344   ;;  %vm69_vm11 = vcmask 720544   ;;  %vm75_vm12 = vcmask 687744  }
  0x12   :  { %43 = vrot.lane.b32.xlu0 %v203_v6, %s265_s28  ;;  %49 = vrot.lane.b32.xlu1 %v204_v7, %s266_s29  ;;  %s285_s28 = smov 20   ;;  %vm81_vm13 = vcmask 654944   ;;  %vm87_vm14 = vcmask 622144   ;;  %vm93_vm15 = vcmask 589344   ;;  %vm99_vm0 = vcmask 556544  }
  0x13   :  { %55 = vrot.lane.b32.xlu2 %v205_v8, %s267_s3 }
  0x1a   :  { %61 = vrot.lane.b32.xlu0 %v206_v9, %s268_s8  ;;  %67 = vrot.lane.b32.xlu1 %v207_v10, %s269_s9  ;;  %s288_s8 = smov 8  }
  0x1b   :  { %73 = vrot.lane.b32.xlu2 %v208_v11, %s270_s12 }
  0x22   :  { %79 = vrot.lane.b32.xlu0 %v209_v12, %s271_s17  ;;  %85 = vrot.lane.b32.xlu1 %v210_v13, %s272_s18 }
  0x23   :  { %91 = vrot.lane.b32.xlu2 %v211_v14, %s273_s21 }
  0x2a   :  { %97 = vrot.lane.b32.xlu0 %v212_v15, %s274_s26  ;;  %103 = vrot.lane.b32.xlu1 %v213_v16, %s275_s27 }
  0x2b   :  { %109 = vrot.lane.b32.xlu2 %v214_v17, %s276_s30 }
  0x32   :  { %115 = vrot.lane.b32.xlu0 %v215_v18, %s277_s6  ;;  %121 = vrot.lane.b32.xlu1 %v216_v19, %s278_s7 }
  0x33   :  { %127 = vrot.lane.b32.xlu2 %v217_v20, %s279_s10 }
  0x3a   :  { %133 = vrot.lane.b32.xlu0 %v218_v21, %s280_s15  ;;  %139 = vrot.lane.b32.xlu1 %v219_v22, %s281_s16 }
  0x3b   :  { %145 = vrot.lane.b32.xlu2 %v220_v23, %s282_s19 }
  0x42   :  { %151 = vrot.lane.b32.xlu0 %v221_v24, %s283_s24  ;;  %157 = vrot.lane.b32.xlu1 %v222_v25, %s284_s25 }
  0x43   :  { %163 = vrot.lane.b32.xlu2 %v223_v26, %s285_s28 }
  0x4a   :  { %169 = vrot.lane.b32.xlu0 %v224_v27, %s286_s4  ;;  %175 = vrot.lane.b32.xlu1 %v225_v28, %s287_s5 }
  0x4b   :  { %181 = vrot.lane.b32.xlu2 %v226_v29, %s288_s8 }
  0x52   :  { %187 = vrot.lane.b32.xlu0 %v227_v30, %s289_s11 }
  0x5d   :  { %v32_v32 = vpop.permute.xlu2 %31  }
  0x65   :  { %v38_v33 = vpop.permute.xlu2 %37  }
  0x6d   :  { %v56_v34 = vpop.permute.xlu2 %55  }
  0x74   :  { %v8_v35 = vpop.permute.xlu0 %7   ;;  %v20_v36 = vpop.permute.xlu1 %19  }
  0x75   :  { %10 = vst.msk [vmem:[#allocation0] sm:$0x1] %vm9_vm1, %v8_v35   ;;  %v74_v37 = vpop.permute.xlu2 %73   ;;  %vm105_vm1 = vcmask 523744  }
  0x7c   :  { %v14_v38 = vpop.permute.xlu0 %13   ;;  %v26_v39 = vpop.permute.xlu1 %25  }
  0x7d   :  { %16 = vst.msk [vmem:[#allocation0] sm:$0x1] %vm15_vm2, %v14_v38   ;;  %v92_v40 = vpop.permute.xlu2 %91   ;;  %vm111_vm2 = vcmask 490944  }
  0x7e   :  { %22 = vst.msk [vmem:[#allocation0] sm:$0x1] %vm21_vm3, %v20_v36   ;;  %vm117_vm3 = vcmask 458144  }
  0x7f   :  { %28 = vst.msk [vmem:[#allocation0] sm:$0x1] %vm27_vm4, %v26_v39   ;;  %vm123_vm4 = vcmask 425344  }
  0x80   :  { %34 = vst.msk [vmem:[#allocation0] sm:$0x1] %vm33_vm5, %v32_v32   ;;  %vm129_vm5 = vcmask 392544  }
  0x81   :  { %40 = vst.msk [vmem:[#allocation0] sm:$0x1] %vm39_vm6, %v38_v33   ;;  %vm135_vm6 = vcmask 359744  }
  0x84   :  { %v44_v41 = vpop.permute.xlu0 %43   ;;  %v50_v42 = vpop.permute.xlu1 %49  }
  0x85   :  { %46 = vst.msk [vmem:[#allocation0] sm:$0x1] %vm45_vm7, %v44_v41   ;;  %v110_v43 = vpop.permute.xlu2 %109   ;;  %vm141_vm7 = vcmask 326944  }
  0x86   :  { %52 = vst.msk [vmem:[#allocation0] sm:$0x1] %vm51_vm8, %v50_v42   ;;  %vm147_vm8 = vcmask 294144  }
  0x87   :  { %58 = vst.msk [vmem:[#allocation0] sm:$0x1] %vm57_vm9, %v56_v34   ;;  %vm153_vm9 = vcmask 261344  }
  0x8c   :  { %v62_v44 = vpop.permute.xlu0 %61   ;;  %v68_v45 = vpop.permute.xlu1 %67  }
  0x8d   :  { %64 = vst.msk [vmem:[#allocation0] sm:$0x1] %vm63_vm10, %v62_v44   ;;  %v128_v46 = vpop.permute.xlu2 %127   ;;  %vm159_vm10 = vcmask 228544  }
  0x8e   :  { %70 = vst.msk [vmem:[#allocation0] sm:$0x1] %vm69_vm11, %v68_v45   ;;  %vm165_vm11 = vcmask 195744  }
  0x8f   :  { %76 = vst.msk [vmem:[#allocation0] sm:$0x1] %vm75_vm12, %v74_v37   ;;  %vm171_vm12 = vcmask 162944  }
  0x94   :  { %v80_v47 = vpop.permute.xlu0 %79   ;;  %v86_v48 = vpop.permute.xlu1 %85  }
  0x95   :  { %82 = vst.msk [vmem:[#allocation0] sm:$0x1] %vm81_vm13, %v80_v47   ;;  %v146_v49 = vpop.permute.xlu2 %145   ;;  %vm177_vm13 = vcmask 130144  }
  0x96   :  { %88 = vst.msk [vmem:[#allocation0] sm:$0x1] %vm87_vm14, %v86_v48   ;;  %vm183_vm14 = vcmask 97344  }
  0x97   :  { %94 = vst.msk [vmem:[#allocation0] sm:$0x1] %vm93_vm15, %v92_v40   ;;  %vm189_vm15 = vcmask 64544  }
  0x9c   :  { %v98_v50 = vpop.permute.xlu0 %97   ;;  %v104_v51 = vpop.permute.xlu1 %103  }
  0x9d   :  { %100 = vst.msk [vmem:[#allocation0] sm:$0x1] %vm99_vm0, %v98_v50   ;;  %v164_v52 = vpop.permute.xlu2 %163  }
  0x9e   :  { %106 = vst.msk [vmem:[#allocation0] sm:$0x1] %vm105_vm1, %v104_v51  }
  0x9f   :  { %112 = vst.msk [vmem:[#allocation0] sm:$0x1] %vm111_vm2, %v110_v43  }
  0xa4   :  { %v116_v53 = vpop.permute.xlu0 %115   ;;  %v122_v54 = vpop.permute.xlu1 %121  }
  0xa5   :  { %118 = vst.msk [vmem:[#allocation0] sm:$0x1] %vm117_vm3, %v116_v53   ;;  %v182_v55 = vpop.permute.xlu2 %181  }
  0xa6   :  { %124 = vst.msk [vmem:[#allocation0] sm:$0x1] %vm123_vm4, %v122_v54  }
  0xa7   :  { %130 = vst.msk [vmem:[#allocation0] sm:$0x1] %vm129_vm5, %v128_v46  }
  0xac   :  { %v134_v56 = vpop.permute.xlu0 %133   ;;  %v140_v57 = vpop.permute.xlu1 %139  }
  0xad   :  { %136 = vst.msk [vmem:[#allocation0] sm:$0x1] %vm135_vm6, %v134_v56  }
  0xae   :  { %142 = vst.msk [vmem:[#allocation0] sm:$0x1] %vm141_vm7, %v140_v57  }
  0xaf   :  { %148 = vst.msk [vmem:[#allocation0] sm:$0x1] %vm147_vm8, %v146_v49  }
  0xb4   :  { %v152_v58 = vpop.permute.xlu0 %151   ;;  %v158_v59 = vpop.permute.xlu1 %157  }
  0xb5   :  { %154 = vst.msk [vmem:[#allocation0] sm:$0x1] %vm153_vm9, %v152_v58  }
  0xb6   :  { %160 = vst.msk [vmem:[#allocation0] sm:$0x1] %vm159_vm10, %v158_v59  }
  0xb7   :  { %166 = vst.msk [vmem:[#allocation0] sm:$0x1] %vm165_vm11, %v164_v52  }
  0xbc   :  { %v170_v60 = vpop.permute.xlu0 %169   ;;  %v176_v61 = vpop.permute.xlu1 %175  }
  0xbd   :  { %172 = vst.msk [vmem:[#allocation0] sm:$0x1] %vm171_vm12, %v170_v60  }
  0xbe   :  { %178 = vst.msk [vmem:[#allocation0] sm:$0x1] %vm177_vm13, %v176_v61  }
  0xbf   :  { %184 = vst.msk [vmem:[#allocation0] sm:$0x1] %vm183_vm14, %v182_v55  }
  0xc4   :  { %v188_v62 = vpop.permute.xlu0 %187  }
  0xc5   :  { %190 = vst.msk [vmem:[#allocation0] sm:$0x1] %vm189_vm15, %v188_v62  }
  0xcc   :  { %v193_v63 = vld [vmem:[#allocation0] sm:$0x1] }
  0xcd   :  { %196 = vst [vmem:[%s400_s1] sm:$0x1] %v193_v63 }

// kernel: hin_res_block.1
= control target key start
LH: loop header
LB: loop body
LE: loop exit
PB: predicated region body
PF: predicated region fallthrough
CT: control target
= control target key end

     0   :  { %v37_v12 = vlaneseq  ;;  %vm355_vm10 = vcmask 130048   ;;  %vm568_vm11 = vcmask 1041408   ;;  %vm561_vm12 = vcmask 15360   ;;  %s1700_s1 = inlined_call_operand.vmem [shape: bf16[384,128], index: 1, kind: input, shape index: {}]   ;;  %s1701_s2 = inlined_call_operand.vmem [shape: f32[1,128], index: 2, kind: input, shape index: {}]   ;;  %s1702_s0 = inlined_call_operand.vmem [shape: f32[16,128], index: 0, kind: input, shape index: {}]   ;;  %s1703_s9 = inlined_call_operand.vmem [shape: f32[256,256], index: 9, kind: input, shape index: {}]   ;;  %s1704_s7 = inlined_call_operand.vmem [shape: f32[2,16], index: 7, kind: input, shape index: {}]   ;;  %s1705_s8 = inlined_call_operand.vmem [shape: f32[16,2], index: 8, kind: input, shape index: {}]   ;;  %s1706_s5 = inlined_call_operand.vmem [shape: f32[1,128], index: 5, kind: input, shape index: {}]   ;;  %s1707_s6 = inlined_call_operand.vmem [shape: f32[1,128], index: 6, kind: input, shape index: {}]   ;;  %s1708_s3 = inlined_call_operand.vmem [shape: bf16[384,128], index: 3, kind: input, shape index: {}]   ;;  %s1709_s4 = inlined_call_operand.vmem [shape: f32[1,128], index: 4, kind: input, shape index: {}]   ;;  %s1710_s10 = inlined_call_operand.vmem [shape: f32[16,128], index: 10, kind: output, shape index: {}]  }
   0x1   :  { %v1127_v0 = vld [vmem:[%s1700_s1 + $0x38] sm:$0xff]  ;;  %v1126_v3 = vld [vmem:[%s1700_s1 + $0x30] sm:$0xff]  ;;  %v1125_v6 = vld [vmem:[%s1700_s1 + $0x28] sm:$0xff] }
   0x2   :  { %v1135_v1 = vld [vmem:[%s1700_s1 + $0x78] sm:$0xff]  ;;  %304 = vmatpush.bf16.msra.mxu0 %v1127_v0  ;;  %v1134_v4 = vld [vmem:[%s1700_s1 + $0x70] sm:$0xff]  ;;  %v1133_v7 = vld [vmem:[%s1700_s1 + $0x68] sm:$0xff]  ;;  %v1275_v16 = vshrl.u32 %v37_v12, 7 }
   0x3   :  { %v1143_v2 = vld [vmem:[%s1700_s1 + $0xb8] sm:$0xff]  ;;  %318 = vmatpush.bf16.msra.mxu1 %v1135_v1  ;;  %v1142_v5 = vld [vmem:[%s1700_s1 + $0xb0] sm:$0xff]  ;;  %v1141_v8 = vld [vmem:[%s1700_s1 + $0xa8] sm:$0xff] }
   0x4   :  { %332 = vmatpush.bf16.msra.mxu2 %v1143_v2  ;;  %v1124_v9 = vld [vmem:[%s1700_s1 + $0x20] sm:$0xff]  ;;  %v1123_v13 = vld [vmem:[%s1700_s1 + $0x18] sm:$0xff]  ;;  %v1122_v17 = vld [vmem:[%s1700_s1 + $0x10] sm:$0xff]  ;;  %v39_v22 = vadd.s32 8, %v1275_v16  ;;  %v44_v25 = vand.u32 7, %v1275_v16  ;;  %vm85_vm0 = vcmp.lt.s32.totalorder %v1275_v16, 1 }
   0x5   :  { %v1132_v10 = vld [vmem:[%s1700_s1 + $0x60] sm:$0xff]  ;;  %v1131_v14 = vld [vmem:[%s1700_s1 + $0x58] sm:$0xff]  ;;  %v1130_v18 = vld [vmem:[%s1700_s1 + $0x50] sm:$0xff]  ;;  %vm96_vm1 = vcmp.lt.s32.totalorder %v1275_v16, 7 }
   0x6   :  { %305 = vmatpush.bf16.msra.mxu0 %v1126_v3  ;;  %v1140_v11 = vld [vmem:[%s1700_s1 + $0xa0] sm:$0xff]  ;;  %v1139_v15 = vld [vmem:[%s1700_s1 + $0x98] sm:$0xff]  ;;  %v1138_v19 = vld [vmem:[%s1700_s1 + $0x90] sm:$0xff]  ;;  %v51_v29 = vand.u32 7, %v39_v22  ;;  %vm1326_vm2 = vcmp.ge.s32.totalorder %v44_v25, 1  ;;  %vm1338_vm4 = vcmp.lt.s32.totalorder %v44_v25, 7 }
   0x7   :  { %319 = vmatpush.bf16.msra.mxu1 %v1134_v4  ;;  %v1289_v20 = vld [vmem:[%s1702_s0] sm:$0xff]  ;;  %v1294_v21 = vld [vmem:[%s1702_s0 + $0x8] sm:$0xff]  ;;  %v430_v47 = vld [vmem:[%s1703_s9 + $0xf8] sm:$0xff] }
   0x8   :  { %333 = vmatpush.bf16.msra.mxu2 %v1142_v5  ;;  %v1121_v23 = vld [vmem:[%s1700_s1 + $0x8] sm:$0xff]  ;;  %v83_v26 = vrot.slane %v1289_v20, 7  ;;  %v84_v27 = vrot.slane %v1294_v21, 7  ;;  %v94_v30 = vrot.slane %v1289_v20, 1  ;;  %v95_v31 = vrot.slane %v1294_v21, 1  ;;  %v1120_v32 = vld [vmem:[%s1700_s1] sm:$0xff] }
   0x9   :  { %v1129_v24 = vld [vmem:[%s1700_s1 + $0x48] sm:$0xff]  ;;  %v1128_v33 = vld [vmem:[%s1700_s1 + $0x40] sm:$0xff]  ;;  %vm1330_vm3 = vcmp.ge.s32.totalorder %v51_v29, 1  ;;  %vm1342_vm5 = vcmp.lt.s32.totalorder %v51_v29, 7  ;;  %v106_v44 = vpack.c.bf16 %v1294_v21, %v1289_v20  ;;  %v426_v50 = vld [vmem:[%s1703_s9 + $0xd8] sm:$0xff] }
   0xa   :  { %306 = vmatpush.bf16.msra.mxu0 %v1125_v6  ;;  %v1137_v28 = vld [vmem:[%s1700_s1 + $0x88] sm:$0xff]  ;;  %v86_v34 = vsel %vm85_vm0, %v83_v26, %v84_v27  ;;  %v87_v35 = vsel %vm85_vm0, %v84_v27, %v83_v26  ;;  %v1136_v36 = vld [vmem:[%s1700_s1 + $0x80] sm:$0xff]  ;;  %v97_v39 = vsel %vm96_vm1, %v94_v30, %v95_v31  ;;  %v98_v40 = vsel %vm96_vm1, %v95_v31, %v94_v30  ;;  %vm1004_vm6 = vmpackc.low %vm1330_vm3, %vm1326_vm2 }
   0xb   :  { %320 = vmatpush.bf16.msra.mxu1 %v1133_v7  ;;  %v1005_v43 = vpack.c.bf16 %v86_v34, %v87_v35  ;;  %v1008_v45 = vpack.c.bf16 %v98_v40, %v97_v39  ;;  %vm1007_vm7 = vmpackc.low %vm1342_vm5, %vm1338_vm4  ;;  %v428_v48 = vld [vmem:[%s1703_s9 + $0xe8] sm:$0xff]  ;;  %v1168_v49 = vld [vmem:[%s1701_s2] ss:$0 sm:$0xff] }
   0xc   :  { %334 = vmatpush.bf16.msra.mxu2 %v1141_v8  ;;  %v424_v52 = vld [vmem:[%s1703_s9 + $0xc8] sm:$0xff]  ;;  %v461_v53 = vld [vmem:[%s1703_s9 + $0x1f0] sm:$0xff]  ;;  %v462_v54 = vld [vmem:[%s1703_s9 + $0x1f8] sm:$0xff] }
   0xd   :  { %v422_v56 = vld [vmem:[%s1703_s9 + $0xb8] sm:$0xff]  ;;  %v459_v58 = vld [vmem:[%s1703_s9 + $0x1e0] sm:$0xff]  ;;  %v460_v59 = vld [vmem:[%s1703_s9 + $0x1e8] sm:$0xff] }
   0xe   :  { %307 = vmatpush.bf16.msra.mxu0 %v1124_v9  ;;  %v420_v61 = vld [vmem:[%s1703_s9 + $0xa8] sm:$0xff]  ;;  %v457_v62 = vld [vmem:[%s1703_s9 + $0x1d0] sm:$0xff]  ;;  %v458_v63 = vld [vmem:[%s1703_s9 + $0x1d8] sm:$0xff] }
   0xf   :  { %321 = vmatpush.bf16.msra.mxu1 %v1132_v10  ;;  %v418_v2 = vld [vmem:[%s1703_s9 + $0x98] sm:$0xff]  ;;  %v455_v3 = vld [vmem:[%s1703_s9 + $0x1c0] sm:$0xff]  ;;  %v456_v4 = vld [vmem:[%s1703_s9 + $0x1c8] sm:$0xff] }
  0x10   :  { %335 = vmatpush.bf16.msra.mxu2 %v1140_v11  ;;  %v416_v5 = vld [vmem:[%s1703_s9 + $0x88] sm:$0xff]  ;;  %v453_v7 = vld [vmem:[%s1703_s9 + $0x1b0] sm:$0xff]  ;;  %v454_v8 = vld [vmem:[%s1703_s9 + $0x1b8] sm:$0xff] }
  0x11   :  { %v414_v11 = vld [vmem:[%s1703_s9 + $0x78] sm:$0xff]  ;;  %v447_v26 = vld [vmem:[%s1703_s9 + $0x180] sm:$0xff]  ;;  %v448_v27 = vld [vmem:[%s1703_s9 + $0x188] sm:$0xff] }
  0x12   :  { %308 = vmatpush.bf16.msra.mxu0 %v1123_v13  ;;  %v450_v22 = vld [vmem:[%s1703_s9 + $0x198] sm:$0xff]  ;;  %v408_v29 = vld [vmem:[%s1703_s9 + $0x48] sm:$0xff]  ;;  %v354_v30 = vld [vmem:[%s1704_s7] sm:$0x3] }
  0x13   :  { %322 = vmatpush.bf16.msra.mxu1 %v1131_v14  ;;  %v451_v14 = vld [vmem:[%s1703_s9 + $0x1a0] sm:$0xff]  ;;  %v410_v25 = vld [vmem:[%s1703_s9 + $0x58] sm:$0xff]  ;;  %v444_v39 = vld [vmem:[%s1703_s9 + $0x168] sm:$0xff] }
  0x14   :  { %336 = vmatpush.bf16.msra.mxu2 %v1139_v15  ;;  %v452_v15 = vld [vmem:[%s1703_s9 + $0x1a8] sm:$0xff]  ;;  %v406_v35 = vld [vmem:[%s1703_s9 + $0x38] sm:$0xff] }
  0x15   :  { %v404_v40 = vld [vmem:[%s1703_s9 + $0x28] sm:$0xff] }
  0x16   :  { %309 = vmatpush.bf16.msra.mxu0 %v1122_v17 }
  0x17   :  { %323 = vmatpush.bf16.msra.mxu1 %v1130_v18  ;;  %v412_v18 = vld [vmem:[%s1703_s9 + $0x68] sm:$0xff] }
  0x18   :  { %337 = vmatpush.bf16.msra.mxu2 %v1138_v19  ;;  %v449_v19 = vld [vmem:[%s1703_s9 + $0x190] sm:$0xff] }
  0x1a   :  { %310 = vmatpush.bf16.msra.mxu0 %v1121_v23 }
  0x1b   :  { %324 = vmatpush.bf16.msra.mxu1 %v1129_v24 }
  0x1c   :  { %338 = vmatpush.bf16.msra.mxu2 %v1137_v28 }
  0x1e   :  { %311 = vmatpush.bf16.msra.mxu0 %v1120_v32  ;;  %v445_v32 = vld [vmem:[%s1703_s9 + $0x170] sm:$0xff] }
  0x1f   :  { %325 = vmatpush.bf16.msra.mxu1 %v1128_v33  ;;  %v446_v33 = vld [vmem:[%s1703_s9 + $0x178] sm:$0xff] }
  0x20   :  { %339 = vmatpush.bf16.msra.mxu2 %v1136_v36  ;;  %v443_v36 = vld [vmem:[%s1703_s9 + $0x160] sm:$0xff] }
  0x21   :  { %1006 = vmatmul.msk.bf16.vlgmr.msra.gmra.mxu0 %vm1004_vm6, %v1005_v43 }
  0x22   :  { %326 = vmatmul.bf16.vlgmr.msra.gmra.mxu1 %v106_v44  ;;  %483 = vmatpush.msrb.mxu0 %v461_v53  ;;  %v429_v44 = vld [vmem:[%s1703_s9 + $0xf0] sm:$0xff] }
  0x23   :  { %1009 = vmatmul.msk.bf16.vlgmr.msra.gmra.mxu2 %vm1007_vm7, %v1008_v45  ;;  %503 = vmatpush.msrb.mxu1 %v430_v47  ;;  %v441_v45 = vld [vmem:[%s1703_s9 + $0x150] sm:$0xff]  ;;  %v402_v47 = vld [vmem:[%s1703_s9 + $0x18] sm:$0xff] }
  0x24   :  { %523 = vmatpush.msrb.mxu2 %v462_v54  ;;  %484 = vmatpush.msrb.mxu0 %v459_v58  ;;  %v417_v53 = vld [vmem:[%s1703_s9 + $0x90] sm:$0xff]  ;;  %v415_v54 = vld [vmem:[%s1703_s9 + $0x80] sm:$0xff] }
  0x25   :  { %504 = vmatpush.msrb.mxu1 %v428_v48  ;;  %v427_v48 = vld [vmem:[%s1703_s9 + $0xe0] sm:$0xff] }
  0x26   :  { %524 = vmatpush.msrb.mxu2 %v460_v59  ;;  %485 = vmatpush.msrb.mxu0 %v457_v62  ;;  %v407_v58 = vld [vmem:[%s1703_s9 + $0x40] sm:$0xff]  ;;  %v405_v59 = vld [vmem:[%s1703_s9 + $0x30] sm:$0xff] }
  0x27   :  { %505 = vmatpush.msrb.mxu1 %v426_v50  ;;  %v423_v50 = vld [vmem:[%s1703_s9 + $0xc0] sm:$0xff] }
  0x28   :  { %525 = vmatpush.msrb.mxu2 %v458_v63  ;;  %486 = vmatpush.msrb.mxu0 %v455_v3  ;;  %v399_v62 = vld [vmem:[%s1703_s9] sm:$0xff]  ;;  %v438_v3 = vld [vmem:[%s1703_s9 + $0x138] sm:$0xff] }
  0x29   :  { %506 = vmatpush.msrb.mxu1 %v424_v52  ;;  %v419_v52 = vld [vmem:[%s1703_s9 + $0xa0] sm:$0xff] }
  0x2a   :  { %526 = vmatpush.msrb.mxu2 %v456_v4  ;;  %487 = vmatpush.msrb.mxu0 %v453_v7  ;;  %v439_v63 = vld [vmem:[%s1703_s9 + $0x140] sm:$0xff]  ;;  %v434_v7 = vld [vmem:[%s1703_s9 + $0x118] sm:$0xff] }
  0x2b   :  { %507 = vmatpush.msrb.mxu1 %v422_v56  ;;  %v411_v56 = vld [vmem:[%s1703_s9 + $0x60] sm:$0xff] }
  0x2c   :  { %527 = vmatpush.msrb.mxu2 %v454_v8  ;;  %488 = vmatpush.msrb.mxu0 %v451_v14  ;;  %v435_v4 = vld [vmem:[%s1703_s9 + $0x120] sm:$0xff] }
  0x2d   :  { %508 = vmatpush.msrb.mxu1 %v420_v61  ;;  %v401_v61 = vld [vmem:[%s1703_s9 + $0x10] sm:$0xff]  ;;  %v431_v8 = vld [vmem:[%s1703_s9 + $0x100] sm:$0xff] }
  0x2e   :  { %528 = vmatpush.msrb.mxu2 %v452_v15  ;;  %489 = vmatpush.msrb.mxu0 %v449_v19 }
  0x2f   :  { %509 = vmatpush.msrb.mxu1 %v418_v2  ;;  %v437_v2 = vld [vmem:[%s1703_s9 + $0x130] sm:$0xff] }
  0x30   :  { %529 = vmatpush.msrb.mxu2 %v450_v22  ;;  %490 = vmatpush.msrb.mxu0 %v447_v26 }
  0x31   :  { %510 = vmatpush.msrb.mxu1 %v416_v5  ;;  %v436_v5 = vld [vmem:[%s1703_s9 + $0x128] sm:$0xff] }
  0x32   :  { %530 = vmatpush.msrb.mxu2 %v448_v27  ;;  %491 = vmatpush.msrb.mxu0 %v445_v32  ;;  %v560_v27 = vld [vmem:[%s1705_s8 + $0x8] sm:$0xff] }
  0x33   :  { %511 = vmatpush.msrb.mxu1 %v414_v11 }
  0x34   :  { %531 = vmatpush.msrb.mxu2 %v446_v33  ;;  %492 = vmatpush.msrb.mxu0 %v443_v36 }
  0x35   :  { %512 = vmatpush.msrb.mxu1 %v412_v18  ;;  %v559_v18 = vld [vmem:[%s1705_s8] sm:$0xff] }
  0x36   :  { %532 = vmatpush.msrb.mxu2 %v444_v39  ;;  %493 = vmatpush.msrb.mxu0 %v441_v45  ;;  %v1167_v45 = vld [vmem:[%s1708_s3 + $0xb8] sm:$0xff] }
  0x37   :  { %513 = vmatpush.msrb.mxu1 %v410_v25 }
  0x38   :  { %494 = vmatpush.msrb.mxu0 %v439_v63  ;;  %v1161_v63 = vld [vmem:[%s1708_s3 + $0x88] sm:$0xff] }
  0x39   :  { %514 = vmatpush.msrb.mxu1 %v408_v29 }
  0x3a   :  { %495 = vmatpush.msrb.mxu0 %v437_v2  ;;  %v1144_v2 = vld [vmem:[%s1708_s3] sm:$0xff] }
  0x3b   :  { %515 = vmatpush.msrb.mxu1 %v406_v35 }
  0x3c   :  { %496 = vmatpush.msrb.mxu0 %v435_v4 }
  0x3d   :  { %516 = vmatpush.msrb.mxu1 %v404_v40 }
  0x3f   :  { %517 = vmatpush.msrb.mxu1 %v402_v47  ;;  %v1150_v47 = vld [vmem:[%s1708_s3 + $0x30] sm:$0xff] }
  0x9e   :  { %v313_v46 = vpop.f32.mrf.mxu0 }
  0x9f   :  { %v327_v51 = vpop.f32.mrf.mxu1  ;;  %v314_v55 = vadd.f32 %v1168_v49, %v313_v46  ;;  %v442_v46 = vld [vmem:[%s1703_s9 + $0x158] sm:$0xff] }
  0xa0   :  { %533 = vmatpush.msrb.mxu2 %v442_v46  ;;  %v1158_v46 = vld [vmem:[%s1708_s3 + $0x70] sm:$0xff] }
  0xa1   :  { %v328_v0 = vadd.f32 %v327_v51, %v314_v55  ;;  %v421_v51 = vld [vmem:[%s1703_s9 + $0xb0] sm:$0xff] }
  0xa2   :  { %v413_v55 = vld [vmem:[%s1703_s9 + $0x70] sm:$0xff] }
  0xa6   :  { %v341_v57 = vpop.f32.mrf.mxu2  ;;  %v315_v60 = vpop.f32.mrf.mxu0 }
  0xa7   :  { %v316_v1 = vadd.f32 %v1168_v49, %v315_v60  ;;  %v329_v6 = vpop.f32.mrf.mxu1  ;;  %v342_v9 = vadd.f32 %v341_v57, %v328_v0  ;;  %v425_v49 = vld [vmem:[%s1703_s9 + $0xd0] sm:$0xff]  ;;  %v403_v60 = vld [vmem:[%s1703_s9 + $0x20] sm:$0xff]  ;;  %v400_v0 = vld [vmem:[%s1703_s9 + $0x8] sm:$0xff] }
  0xa8   :  { %v409_v57 = vld [vmem:[%s1703_s9 + $0x50] sm:$0xff]  ;;  %518 = vmatpush.msrb.mxu1 %v400_v0 }
  0xa9   :  { %v330_v10 = vadd.f32 %v329_v6, %v316_v1  ;;  %v348_v23 = vmul.f32 0.2, %v342_v9  ;;  %vm346_vm9 = vcmp.ge.f32.partialorder %v342_v9, 0.0  ;;  %v440_v1 = vld [vmem:[%s1703_s9 + $0x148] sm:$0xff]  ;;  %v433_v6 = vld [vmem:[%s1703_s9 + $0x110] sm:$0xff] }
  0xaa   :  { %534 = vmatpush.msrb.mxu2 %v440_v1  ;;  %497 = vmatpush.msrb.mxu0 %v433_v6  ;;  %v1152_v1 = vld [vmem:[%s1708_s3 + $0x40] sm:$0xff] }
  0xab   :  { %v1467_v34 = vsel %vm346_vm9, %v342_v9, %v348_v23  ;;  %v432_v9 = vld [vmem:[%s1703_s9 + $0x108] sm:$0xff] }
  0xac   :  { %v352_v43 = vmul.f32 %v1467_v34, %v1467_v34  ;;  %535 = vmatpush.msrb.mxu2 %v438_v3  ;;  %498 = vmatpush.msrb.mxu0 %v431_v8  ;;  %v1160_v3 = vld [vmem:[%s1708_s3 + $0x80] sm:$0xff]  ;;  %v69_v8 = vand.u32 127, %v37_v12 }
  0xae   :  { %v343_v13 = vpop.f32.mrf.mxu2  ;;  %536 = vmatpush.msrb.mxu2 %v436_v5 }
  0xaf   :  { %v344_v17 = vadd.f32 %v343_v13, %v330_v10 }
  0xb0   :  { %537 = vmatpush.msrb.mxu2 %v434_v7  ;;  %v1169_v7 = vld [vmem:[%s1706_s5] ss:$0 sm:$0xff] }
  0xb1   :  { %vm347_vm8 = vcmp.ge.f32.partialorder %v344_v17, 0.0  ;;  %v349_v24 = vmul.f32 0.2, %v344_v17 }
  0xb2   :  { %538 = vmatpush.msrb.mxu2 %v432_v9 }
  0xb3   :  { %v1450_v28 = vsel %vm347_vm8, %v344_v17, %v349_v24 }
  0xb4   :  { %373 = vmatpush.msra.mxu3 %v1450_v28  ;;  %v353_v31 = vmul.f32 %v1450_v28, %v1450_v28  ;;  %880 = vmatpush.bf16.msra.mxu2 %v1167_v45 }
  0xb6   :  { %374 = vmatpush.msra.mxu3 %v1467_v34 }
  0xb7   :  { %1010 = vmatmul.msk.f32.vlgmr.msra.gmra.mxu3 %vm355_vm10, %v354_v30 }
  0xb8   :  { %393 = vmatpush.msrb.mxu3 %v353_v31 }
  0xba   :  { %394 = vmatpush.msrb.mxu3 %v352_v43  ;;  %v1159_v43 = vld [vmem:[%s1708_s3 + $0x78] sm:$0xff] }
  0xbb   :  { %866 = vmatpush.bf16.msra.mxu1 %v1159_v43 }
  0xbc   :  { %463 = vmatpush.msra.mxu3 %v429_v44  ;;  %v1151_v44 = vld [vmem:[%s1708_s3 + $0x38] sm:$0xff] }
  0xbd   :  { %852 = vmatpush.bf16.msra.mxu0 %v1151_v44 }
  0xbe   :  { %464 = vmatpush.msra.mxu3 %v427_v48  ;;  %v1166_v48 = vld [vmem:[%s1708_s3 + $0xb0] sm:$0xff] }
  0xbf   :  { %1011 = vmatmul.msk.f32.vlgmr.msrb.gmra.mxu3 %vm355_vm10, %v354_v30  ;;  %867 = vmatpush.bf16.msra.mxu1 %v1158_v46 }
  0xc0   :  { %465 = vmatpush.msra.mxu3 %v425_v49  ;;  %v1157_v49 = vld [vmem:[%s1708_s3 + $0x68] sm:$0xff]  ;;  %881 = vmatpush.bf16.msra.mxu2 %v1166_v48 }
  0xc1   :  { %853 = vmatpush.bf16.msra.mxu0 %v1150_v47 }
  0xc2   :  { %466 = vmatpush.msra.mxu3 %v423_v50  ;;  %v1149_v50 = vld [vmem:[%s1708_s3 + $0x28] sm:$0xff] }
  0xc3   :  { %868 = vmatpush.bf16.msra.mxu1 %v1157_v49 }
  0xc4   :  { %467 = vmatpush.msra.mxu3 %v421_v51  ;;  %v1165_v51 = vld [vmem:[%s1708_s3 + $0xa8] sm:$0xff] }
  0xc5   :  { %854 = vmatpush.bf16.msra.mxu0 %v1149_v50  ;;  %882 = vmatpush.bf16.msra.mxu2 %v1165_v51 }
  0xc6   :  { %468 = vmatpush.msra.mxu3 %v419_v52  ;;  %v1156_v52 = vld [vmem:[%s1708_s3 + $0x60] sm:$0xff] }
  0xc7   :  { %869 = vmatpush.bf16.msra.mxu1 %v1156_v52 }
  0xc8   :  { %469 = vmatpush.msra.mxu3 %v417_v53  ;;  %v1148_v53 = vld [vmem:[%s1708_s3 + $0x20] sm:$0xff] }
  0xc9   :  { %855 = vmatpush.bf16.msra.mxu0 %v1148_v53 }
  0xca   :  { %470 = vmatpush.msra.mxu3 %v415_v54  ;;  %v1164_v54 = vld [vmem:[%s1708_s3 + $0xa0] sm:$0xff] }
  0xcb   :  { %883 = vmatpush.bf16.msra.mxu2 %v1164_v54 }
  0xcc   :  { %471 = vmatpush.msra.mxu3 %v413_v55  ;;  %v1155_v55 = vld [vmem:[%s1708_s3 + $0x58] sm:$0xff] }
  0xcd   :  { %870 = vmatpush.bf16.msra.mxu1 %v1155_v55 }
  0xce   :  { %472 = vmatpush.msra.mxu3 %v411_v56  ;;  %v1147_v56 = vld [vmem:[%s1708_s3 + $0x18] sm:$0xff] }
  0xcf   :  { %856 = vmatpush.bf16.msra.mxu0 %v1147_v56 }
  0xd0   :  { %473 = vmatpush.msra.mxu3 %v409_v57  ;;  %v1163_v57 = vld [vmem:[%s1708_s3 + $0x98] sm:$0xff] }
  0xd1   :  { %884 = vmatpush.bf16.msra.mxu2 %v1163_v57 }
  0xd2   :  { %474 = vmatpush.msra.mxu3 %v407_v58  ;;  %v1154_v58 = vld [vmem:[%s1708_s3 + $0x50] sm:$0xff] }
  0xd3   :  { %871 = vmatpush.bf16.msra.mxu1 %v1154_v58 }
  0xd4   :  { %475 = vmatpush.msra.mxu3 %v405_v59  ;;  %v1146_v59 = vld [vmem:[%s1708_s3 + $0x10] sm:$0xff] }
  0xd5   :  { %857 = vmatpush.bf16.msra.mxu0 %v1146_v59 }
  0xd6   :  { %476 = vmatpush.msra.mxu3 %v403_v60  ;;  %v1162_v60 = vld [vmem:[%s1708_s3 + $0x90] sm:$0xff] }
  0xd7   :  { %885 = vmatpush.bf16.msra.mxu2 %v1162_v60 }
  0xd8   :  { %477 = vmatpush.msra.mxu3 %v401_v61  ;;  %v1153_v61 = vld [vmem:[%s1708_s3 + $0x48] sm:$0xff] }
  0xd9   :  { %872 = vmatpush.bf16.msra.mxu1 %v1153_v61 }
  0xda   :  { %478 = vmatpush.msra.mxu3 %v399_v62  ;;  %v1145_v62 = vld [vmem:[%s1708_s3 + $0x8] sm:$0xff] }
  0xdb   :  { %858 = vmatpush.bf16.msra.mxu0 %v1145_v62  ;;  %886 = vmatpush.bf16.msra.mxu2 %v1161_v63 }
  0xdd   :  { %873 = vmatpush.bf16.msra.mxu1 %v1152_v1 }
  0xdf   :  { %859 = vmatpush.bf16.msra.mxu0 %v1144_v2  ;;  %887 = vmatpush.bf16.msra.mxu2 %v1160_v3 }
 0x13a   :  { %v376_v10 = vpop.f32.mrf.mxu3 }
 0x13b   :  { %479 = vmatmul.f32.vlgmr.msra.gmra.mxu3 %v376_v10  ;;  %519 = vmatmul.f32.vlgmr.msrb.gmra.mxu1 %v376_v10 }
 0x142   :  { %v396_v11 = vpop.f32.mrf.mxu3 }
 0x143   :  { %499 = vmatmul.f32.vlgmr.msrb.gmra.mxu0 %v396_v11  ;;  %539 = vmatmul.f32.vlgmr.msrb.gmra.mxu2 %v396_v11  ;;  %v1170_v11 = vld [vmem:[%s1707_s6] ss:$0 sm:$0xff] }
 0x1b8   :  { %v520_v19 = vpop.f32.mrf.mxu1 }
 0x1be   :  { %v480_v13 = vpop.f32.mrf.mxu3 }
 0x1c0   :  { %v500_v14 = vpop.f32.mrf.mxu0 }
 0x1c1   :  { %v501_v15 = vadd.f32 %v500_v14, %v480_v13  ;;  %v74_v13 = vand.u32 3, %v69_v8 }
 0x1c3   :  { %v543_v17 = vmul.f32 0.00390625, %v501_v15  ;;  %vm82_vm8 = vcmp.lt.s32.totalorder %v74_v13, 2 }
 0x1c5   :  { %1012 = vmatpush.msk.msrb.mxu3 %vm568_vm11, %v543_v17  ;;  %v545_v24 = vmul.f32 %v543_v17, %v543_v17 }
 0x1c6   :  { %v540_v22 = vpop.f32.mrf.mxu2  ;;  %1013 = vmatmul.msk.f32.vlgmr.msrb.gmra.mxu3 %vm561_vm12, %v559_v18 }
 0x1c7   :  { %v541_v23 = vadd.f32 %v540_v22, %v520_v19 }
 0x1c9   :  { %v544_v25 = vmul.f32 0.00390625, %v541_v23 }
 0x1cb   :  { %v546_v26 = vsub.f32 %v544_v25, %v545_v24 }
 0x1cd   :  { %v547_v29 = vmax.f32 %v546_v26, 0.0 }
 0x1ce   :  { %1014 = vmatmul.msk.f32.gmra.mxu3 %vm561_vm12, %v560_v27 }
 0x1cf   :  { %v548_v30 = vadd.f32 1e-05, %v547_v29 }
 0x1d1   :  { %1172 = vrsqrt.f32 %v548_v30  ;;  %vm555_vm14 = vweird.f32 %v548_v30 }
 0x1d7   :  { %v1173_v31 = vpop.eup %1172 }
 0x1d8   :  { %v550_v32 = vmul.f32 %v1173_v31, %v548_v30  ;;  %vm556_vm13 = vweird.f32 %v1173_v31 }
 0x1d9   :  { %vm557_vm15 = vmor %vm555_vm14, %vm556_vm13 }
 0x1da   :  { %v551_v33 = vmul.f32 %v1173_v31, %v550_v32 }
 0x1dc   :  { %v552_v35 = vmul.f32 0.5, %v551_v33 }
 0x1de   :  { %v553_v36 = vsub.f32 1.5, %v552_v35 }
 0x1e0   :  { %v554_v39 = vmul.f32 %v1173_v31, %v553_v36 }
 0x1e2   :  { %v558_v40 = vsel %vm557_vm15, %v1173_v31, %v554_v39 }
 0x1e3   :  { %1015 = vmatpush.msk.msra.mxu3 %vm568_vm11, %v558_v40 }
 0x1e4   :  { %1016 = vmatmul.msk.f32.vlgmr.msra.gmra.mxu3 %vm561_vm12, %v559_v18 }
 0x1ec   :  { %1017 = vmatmul.msk.f32.gmra.mxu3 %vm561_vm12, %v560_v27 }
 0x249   :  { %v592_v0 = vpop.f32.mrf.mxu3 }
 0x24a   :  { %v621_v5 = vsub.f32 %v1467_v34, %v592_v0 }
 0x251   :  { %v595_v4 = vpop.f32.mrf.mxu3 }
 0x252   :  { %v622_v14 = vsub.f32 %v1450_v28, %v595_v4 }
 0x267   :  { %v615_v6 = vpop.f32.mrf.mxu3 }
 0x268   :  { %v623_v9 = vmul.f32 %v621_v5, %v615_v6 }
 0x26a   :  { %v629_v10 = vmul.f32 %v1169_v7, %v623_v9 }
 0x26c   :  { %v635_v15 = vadd.f32 %v1170_v11, %v629_v10 }
 0x26e   :  { %v639_v22 = vsel %vm82_vm8, %v635_v15, %v1467_v34 }
 0x26f   :  { %v618_v17 = vpop.f32.mrf.mxu3  ;;  %v641_v24 = vrot.slane %v639_v22, 7  ;;  %v647_v25 = vrot.slane %v639_v22, 1 }
 0x270   :  { %v624_v18 = vmul.f32 %v622_v14, %v618_v17 }
 0x272   :  { %v630_v19 = vmul.f32 %v1169_v7, %v624_v18 }
 0x274   :  { %v636_v23 = vadd.f32 %v1170_v11, %v630_v19 }
 0x276   :  { %v640_v12 = vsel %vm82_vm8, %v636_v23, %v1450_v28  ;;  %v1171_v28 = vld [vmem:[%s1709_s4] ss:$0 sm:$0xff] }
 0x277   :  { %v642_v26 = vrot.slane %v640_v12, 7  ;;  %v648_v27 = vrot.slane %v640_v12, 1  ;;  %v654_v29 = vpack.c.bf16 %v640_v12, %v639_v22 }
 0x279   :  { %874 = vmatmul.bf16.vlgmr.msra.gmra.mxu1 %v654_v29  ;;  %v643_v30 = vsel %vm85_vm0, %v641_v24, %v642_v26  ;;  %v644_v31 = vsel %vm85_vm0, %v642_v26, %v641_v24  ;;  %v649_v32 = vsel %vm96_vm1, %v647_v25, %v648_v27  ;;  %v650_v34 = vsel %vm96_vm1, %v648_v27, %v647_v25 }
 0x27a   :  { %v1115_v33 = vpack.c.bf16 %v643_v30, %v644_v31  ;;  %v1118_v35 = vpack.c.bf16 %v650_v34, %v649_v32 }
 0x27c   :  { %1116 = vmatmul.msk.bf16.vlgmr.msra.gmra.mxu0 %vm1004_vm6, %v1115_v33  ;;  %1119 = vmatmul.msk.bf16.vlgmr.msra.gmra.mxu2 %vm1007_vm7, %v1118_v35 }
 0x2f6   :  { %v875_v39 = vpop.f32.mrf.mxu1 }
 0x2f9   :  { %v861_v16 = vpop.f32.mrf.mxu0 }
 0x2fa   :  { %v862_v36 = vadd.f32 %v1171_v28, %v861_v16 }
 0x2fc   :  { %v876_v40 = vadd.f32 %v875_v39, %v862_v36 }
 0x2fe   :  { %v877_v42 = vpop.f32.mrf.mxu1 }
 0x2ff   :  { %v889_v43 = vpop.f32.mrf.mxu2 }
 0x300   :  { %v890_v38 = vadd.f32 %v889_v43, %v876_v40 }
 0x301   :  { %v863_v44 = vpop.f32.mrf.mxu0 }
 0x302   :  { %vm894_vm0 = vcmp.ge.f32.partialorder %v890_v38, 0.0  ;;  %v896_v37 = vmul.f32 0.2, %v890_v38  ;;  %v864_v45 = vadd.f32 %v1171_v28, %v863_v44 }
 0x304   :  { %v898_v46 = vsel %vm894_vm0, %v890_v38, %v896_v37  ;;  %v878_v47 = vadd.f32 %v877_v42, %v864_v45 }
 0x305   :  { %v900_v41 = vadd.f32 %v898_v46, %v1289_v20 }
 0x307   :  { %902 = vst [vmem:[%s1710_s10] sm:$0xff] %v900_v41  ;;  %v891_v48 = vpop.f32.mrf.mxu2 }
 0x308   :  { %v892_v49 = vadd.f32 %v891_v48, %v878_v47 }
 0x30a   :  { %vm895_vm1 = vcmp.ge.f32.partialorder %v892_v49, 0.0  ;;  %v897_v50 = vmul.f32 0.2, %v892_v49 }
 0x30c   :  { %v899_v51 = vsel %vm895_vm1, %v892_v49, %v897_v50 }
 0x30d   :  { %v901_v52 = vadd.f32 %v899_v51, %v1294_v21 }
 0x30f   :  { %903 = vst [vmem:[%s1710_s10 + $0x8] sm:$0xff] %v901_v52 }

</bundles_post_ra>
